<compile_context>
chip_gen: v7x
topology: tpu7x:2x2x1
jax: 0.10.0
libtpu: 0.0.40
codegen_flags: <defaults>
</compile_context>

<pallas_src>
import functools
import math

import jax
import jax.numpy as jnp
from jax.experimental import pallas as pl
from jax.experimental.pallas import tpu as pltpu


def lean_kernel(x_ref, w1_ref, b1_ref, w2_ref, b2_ref, wfc_ref, bfc_ref,
                pool_ref, out_ref, *, L):
    """One batch tile (Bt samples) per grid step.

    x_ref   : (48, Bt*L)   input, batch folded into lanes (per-batch segments of L)
    w1_ref  : (3, 16, 48)  conv1 weight, tap-major
    b1_ref  : (16, 1)
    w2_ref  : (3, 8, 16)   conv2 weight, tap-major
    b2_ref  : (8, 1)
    wfc_ref : (2, 8)
    bfc_ref : (2, 1)
    pool_ref: (Bt*L, Bt)   block-diagonal averaging matrix (1/L per segment)
    out_ref : (1, 2, Bt)   logits for this tile, batch on lanes
    """
    x = x_ref[...]                      # (48, N)
    N = x.shape[-1]

    # Per-batch boundary masks for the shifted conv taps (shared by both layers).
    col = jax.lax.broadcasted_iota(jnp.int32, (1, N), 1)
    pos = col % L
    keep_m1 = pos != 0                  # value at l-1 exists (else zero padding)
    keep_p1 = pos != (L - 1)            # value at l+1 exists (else zero padding)

    def taps(a):
        # a[:, i-1] and a[:, i+1] via circular XLU rolls; wrapped / cross-batch
        # columns are zeroed to emulate per-sample zero padding.
        a_m1 = jnp.where(keep_m1, pltpu.roll(a, shift=1, axis=1), 0)
        a_p1 = jnp.where(keep_p1, pltpu.roll(a, shift=N - 1, axis=1), 0)
        return a_m1, a_p1

    # ---- conv1 (48 -> 16, k=3, pad=1) + ReLU : 3 lane-dense matmuls ----
    x_m1, x_p1 = taps(x)
    acc1 = jnp.dot(w1_ref[0], x_m1, preferred_element_type=jnp.float32)
    acc1 += jnp.dot(w1_ref[1], x, preferred_element_type=jnp.float32)
    acc1 += jnp.dot(w1_ref[2], x_p1, preferred_element_type=jnp.float32)
    h1 = jnp.maximum(acc1 + b1_ref[...], 0.0)            # (16, N) f32
    h1 = h1.astype(x.dtype)

    # ---- conv2 (16 -> 8, k=3, pad=1) + ReLU ----
    h1_m1, h1_p1 = taps(h1)
    acc2 = jnp.dot(w2_ref[0], h1_m1, preferred_element_type=jnp.float32)
    acc2 += jnp.dot(w2_ref[1], h1, preferred_element_type=jnp.float32)
    acc2 += jnp.dot(w2_ref[2], h1_p1, preferred_element_type=jnp.float32)
    h2 = jnp.maximum(acc2 + b2_ref[...], 0.0)            # (8, N) f32

    # ---- adaptive avg pool (mean over L per sample) as one matmul ----
    pooled = jnp.dot(h2, pool_ref[...],
                     preferred_element_type=jnp.float32)  # (8, Bt)

    # ---- fc (8 -> 2), batched over the tile; single store, batch on lanes ----
    logits = jnp.dot(wfc_ref[...], pooled,
                     preferred_element_type=jnp.float32) + bfc_ref[...]  # (2, Bt)
    out_ref[0] = logits


def lean_forward(x, params, *, use_bf16=False):
    """x: (B, 48, L) float32 -> (B, 2) float32."""
    w1, b1, w2, b2, wfc, bfc = params
    B, Cin, L = x.shape
    assert Cin == 48

    # Smallest batch tile with Bt*L a multiple of 128 (lane-dense blocks, safe rolls).
    bt = 128 // math.gcd(L, 128)
    num_tiles = -(-B // bt)
    B_pad = num_tiles * bt
    N = bt * L

    cdt = jnp.bfloat16 if use_bf16 else jnp.float32

    # (B, 48, L) -> (48, B_pad*L): channels on sublanes, batch folded into lanes.
    xt = jnp.transpose(x, (1, 0, 2)).astype(cdt)          # (48, B, L)
    xt = jnp.pad(xt, ((0, 0), (0, B_pad - B), (0, 0)))    # zero batches are inert
    xt = xt.reshape(48, B_pad * L)

    w1t = jnp.transpose(w1, (2, 0, 1)).astype(cdt)        # (3, 16, 48)
    w2t = jnp.transpose(w2, (2, 0, 1)).astype(cdt)        # (3, 8, 16)
    b1c = b1.reshape(16, 1).astype(jnp.float32)
    b2c = b2.reshape(8, 1).astype(jnp.float32)
    wfc32 = wfc.astype(jnp.float32)                       # (2, 8)
    bfcc = bfc.reshape(2, 1).astype(jnp.float32)

    # Block-diagonal averaging matrix: pool[i, b] = 1/L if i // L == b else 0.
    seg = jnp.arange(N, dtype=jnp.int32) // L
    pool = (seg[:, None] == jnp.arange(bt, dtype=jnp.int32)[None, :]
            ).astype(jnp.float32) / L                     # (N, bt)

    flops = 2 * B_pad * L * (16 * 48 * 3 + 8 * 16 * 3) + 2 * B_pad * (8 * L + 16)
    bytes_accessed = int(
        xt.size * xt.dtype.itemsize
        + sum(a.size * a.dtype.itemsize
              for a in (w1t, w2t, b1c, b2c, wfc32, bfcc, pool))
        + num_tiles * 2 * bt * 4)

    out = pl.pallas_call(
        functools.partial(lean_kernel, L=L),
        out_shape=jax.ShapeDtypeStruct((num_tiles, 2, bt), jnp.float32),
        grid_spec=pltpu.PrefetchScalarGridSpec(
            num_scalar_prefetch=0,
            grid=(num_tiles,),
            in_specs=[
                pl.BlockSpec((48, N), lambda i: (0, i)),          # input: tiled over batch
                pl.BlockSpec((3, 16, 48), lambda i: (0, 0, 0)),   # weights: VMEM residents
                pl.BlockSpec((16, 1), lambda i: (0, 0)),
                pl.BlockSpec((3, 8, 16), lambda i: (0, 0, 0)),
                pl.BlockSpec((8, 1), lambda i: (0, 0)),
                pl.BlockSpec((2, 8), lambda i: (0, 0)),
                pl.BlockSpec((2, 1), lambda i: (0, 0)),
                pl.BlockSpec((N, bt), lambda i: (0, 0)),
            ],
            out_specs=pl.BlockSpec((1, 2, bt), lambda i: (i, 0, 0)),
        ),
        compiler_params=pltpu.CompilerParams(
            dimension_semantics=("parallel",)),
        cost_estimate=pl.CostEstimate(flops=flops, transcendentals=0,
                                      bytes_accessed=bytes_accessed),
    )(xt, w1t, b1c, w2t, b2c, wfc32, bfcc, pool)

    # (num_tiles, 2, bt) -> (B, 2)
    out = jnp.transpose(out, (0, 2, 1)).reshape(B_pad, 2)[:B]
    return out


def ref_forward(x, params):
    """Pure-JAX reference of the PyTorch forward pass."""
    w1, b1, w2, b2, wfc, bfc = params
    B, _, L = x.shape
    xp = jnp.pad(x, ((0, 0), (0, 0), (1, 1)))
    h1 = sum(jnp.einsum('oc,bcl->bol', w1[:, :, k], xp[:, :, k:k + L])
             for k in range(3)) + b1[None, :, None]
    h1 = jax.nn.relu(h1)
    h1p = jnp.pad(h1, ((0, 0), (0, 0), (1, 1)))
    h2 = sum(jnp.einsum('oc,bcl->bol', w2[:, :, k], h1p[:, :, k:k + L])
             for k in range(3)) + b2[None, :, None]
    h2 = jax.nn.relu(h2)
    pooled = jnp.mean(h2, axis=-1)          # (B, 8)
    return pooled @ wfc.T + bfc[None, :]    # (B, 2)


def init_params(key):
    k1, k2, k3, k4, k5, k6 = jax.random.split(key, 6)
    w1 = 0.1 * jax.random.normal(k1, (16, 48, 3), jnp.float32)  # Conv1d(48,16,3)
    b1 = 0.1 * jax.random.normal(k2, (16,), jnp.float32)
    w2 = 0.1 * jax.random.normal(k3, (8, 16, 3), jnp.float32)   # Conv1d(16,8,3)
    b2 = 0.1 * jax.random.normal(k4, (8,), jnp.float32)
    wfc = 0.1 * jax.random.normal(k5, (2, 8), jnp.float32)      # Linear(8,2)
    bfc = 0.1 * jax.random.normal(k6, (2,), jnp.float32)
    return (w1, b1, w2, b2, wfc, bfc)


if __name__ == "__main__":
    key = jax.random.PRNGKey(0)
    kp, kx = jax.random.split(key)
    params = init_params(kp)

    B, C, L = 2, 48, 32
    x = jax.random.normal(kx, (B, C, L), jnp.float32)

    out = lean_forward(x, params)          # f32 path for tight verification
    out = jax.block_until_ready(out)

    ref = ref_forward(x, params)
    assert out.shape == (B, 2)
    assert jnp.allclose(out, ref, rtol=1e-4, atol=1e-4), (out, ref)

    print("KERNEL_OK")
</pallas_src>

<mosaic_0001>
module attributes {stable_mosaic.version = 11 : i64} {
  func.func @lean_kernel(%arg0: i32, %arg1: memref<48x128xf32, #tpu.memory_space<vmem>>, %arg2: memref<3x16x48xf32, #tpu.memory_space<vmem>>, %arg3: memref<16x1xf32, #tpu.memory_space<vmem>>, %arg4: memref<3x8x16xf32, #tpu.memory_space<vmem>>, %arg5: memref<8x1xf32, #tpu.memory_space<vmem>>, %arg6: memref<2x8xf32, #tpu.memory_space<vmem>>, %arg7: memref<2x1xf32, #tpu.memory_space<vmem>>, %arg8: memref<128x4xf32, #tpu.memory_space<vmem>>, %arg9: memref<1x2x4xf32, #tpu.memory_space<vmem>>) attributes {dimension_semantics = [#tpu.dimension_semantics<parallel>], iteration_bounds = array<i64: 1>, scalar_prefetch = 0 : i64, scratch_operands = 0 : i64, tpu.core_type = #tpu.core_type<tc>, window_params = [{transform_indices = @transform_0, window_bounds = array<i64: 48, 128>}, {pipeline_mode = #tpu.pipeline_mode<synchronous>, transform_indices = @transform_1, window_bounds = array<i64: 3, 16, 48>}, {pipeline_mode = #tpu.pipeline_mode<synchronous>, transform_indices = @transform_2, window_bounds = array<i64: 16, 1>}, {pipeline_mode = #tpu.pipeline_mode<synchronous>, transform_indices = @transform_3, window_bounds = array<i64: 3, 8, 16>}, {pipeline_mode = #tpu.pipeline_mode<synchronous>, transform_indices = @transform_4, window_bounds = array<i64: 8, 1>}, {pipeline_mode = #tpu.pipeline_mode<synchronous>, transform_indices = @transform_5, window_bounds = array<i64: 2, 8>}, {pipeline_mode = #tpu.pipeline_mode<synchronous>, transform_indices = @transform_6, window_bounds = array<i64: 2, 1>}, {pipeline_mode = #tpu.pipeline_mode<synchronous>, transform_indices = @transform_7, window_bounds = array<i64: 128, 4>}, {transform_indices = @transform_8, window_bounds = array<i64: 1, 2, 4>}]} {
    %c0 = arith.constant 0 : index
    %c0_0 = arith.constant 0 : index
    %0 = vector.load %arg1[%c0, %c0_0] : memref<48x128xf32, #tpu.memory_space<vmem>>, vector<48x128xf32>
    %1 = tpu.iota {dimensions = array<i32: 1>} : vector<1x128xi32>
    %c32_i32 = arith.constant 32 : i32
    %c0_i32 = arith.constant 0 : i32
    %2 = arith.cmpi eq, %c32_i32, %c0_i32 : i32
    %c1_i32 = arith.constant 1 : i32
    %3 = arith.select %2, %c1_i32, %c32_i32 : i32
    %4 = vector.broadcast %3 : i32 to vector<1x128xi32>
    %5 = arith.remsi %1, %4 : vector<1x128xi32>
    %c0_i32_1 = arith.constant 0 : i32
    %6 = vector.broadcast %c0_i32_1 : i32 to vector<1x128xi32>
    %7 = arith.cmpi ne, %5, %6 : vector<1x128xi32>
    %c0_i32_2 = arith.constant 0 : i32
    %8 = vector.broadcast %c0_i32_2 : i32 to vector<1x128xi32>
    %9 = arith.cmpi slt, %5, %8 : vector<1x128xi32>
    %c0_i32_3 = arith.constant 0 : i32
    %10 = arith.cmpi slt, %3, %c0_i32_3 : i32
    %11 = vector.broadcast %10 : i1 to vector<1x128xi1>
    %12 = vector.broadcast %11 : vector<1x128xi1> to vector<1x128xi1>
    %13 = arith.xori %9, %12 : vector<1x128xi1>
    %14 = arith.andi %13, %7 : vector<1x128xi1>
    %15 = vector.broadcast %3 : i32 to vector<1x128xi32>
    %16 = arith.addi %5, %15 : vector<1x128xi32>
    %17 = arith.select %14, %16, %5 : vector<1x128xi1>, vector<1x128xi32>
    %c0_i32_4 = arith.constant 0 : i32
    %18 = vector.broadcast %c0_i32_4 : i32 to vector<1x128xi32>
    %19 = arith.cmpi ne, %17, %18 : vector<1x128xi32>
    %c31_i32 = arith.constant 31 : i32
    %20 = vector.broadcast %c31_i32 : i32 to vector<1x128xi32>
    %21 = arith.cmpi ne, %17, %20 : vector<1x128xi32>
    %c1_i32_5 = arith.constant 1 : i32
    %22 = tpu.dynamic_rotate %0 by %c1_i32_5 dim 1 : vector<48x128xf32>, i32 -> vector<48x128xf32>
    %c0_i32_6 = arith.constant 0 : i32
    %23 = arith.sitofp %c0_i32_6 : i32 to f32
    %24 = vector.shape_cast %19 : vector<1x128xi1> to vector<1x128xi1>
    %25 = vector.broadcast %24 : vector<1x128xi1> to vector<48x128xi1>
    %26 = vector.broadcast %23 : f32 to vector<48x128xf32>
    %27 = arith.select %25, %22, %26 : vector<48x128xi1>, vector<48x128xf32>
    %c127_i32 = arith.constant 127 : i32
    %28 = tpu.dynamic_rotate %0 by %c127_i32 dim 1 : vector<48x128xf32>, i32 -> vector<48x128xf32>
    %c0_i32_7 = arith.constant 0 : i32
    %29 = arith.sitofp %c0_i32_7 : i32 to f32
    %30 = vector.shape_cast %21 : vector<1x128xi1> to vector<1x128xi1>
    %31 = vector.broadcast %30 : vector<1x128xi1> to vector<48x128xi1>
    %32 = vector.broadcast %29 : f32 to vector<48x128xf32>
    %33 = arith.select %31, %28, %32 : vector<48x128xi1>, vector<48x128xf32>
    %c0_8 = arith.constant 0 : index
    %c0_9 = arith.constant 0 : index
    %c0_10 = arith.constant 0 : index
    %34 = vector.load %arg2[%c0_8, %c0_9, %c0_10] : memref<3x16x48xf32, #tpu.memory_space<vmem>>, vector<1x16x48xf32>
    %35 = vector.shape_cast %34 : vector<1x16x48xf32> to vector<16x48xf32>
    %cst = arith.constant dense<0.000000e+00> : vector<16x128xf32>
    %36 = tpu.matmul %35, %27, %cst {dimension_numbers = #tpu.dot_dimension_numbers<[1], [0], [0], [1], [0, 0, 1, 1], [], []>} : vector<16x48xf32>, vector<48x128xf32>, vector<16x128xf32> -> vector<16x128xf32>
    %c1 = arith.constant 1 : index
    %c0_11 = arith.constant 0 : index
    %c0_12 = arith.constant 0 : index
    %37 = vector.load %arg2[%c1, %c0_11, %c0_12] : memref<3x16x48xf32, #tpu.memory_space<vmem>>, vector<1x16x48xf32>
    %38 = vector.shape_cast %37 : vector<1x16x48xf32> to vector<16x48xf32>
    %cst_13 = arith.constant dense<0.000000e+00> : vector<16x128xf32>
    %39 = tpu.matmul %38, %0, %cst_13 {dimension_numbers = #tpu.dot_dimension_numbers<[1], [0], [0], [1], [0, 0, 1, 1], [], []>} : vector<16x48xf32>, vector<48x128xf32>, vector<16x128xf32> -> vector<16x128xf32>
    %40 = arith.addf %36, %39 : vector<16x128xf32>
    %c2 = arith.constant 2 : index
    %c0_14 = arith.constant 0 : index
    %c0_15 = arith.constant 0 : index
    %41 = vector.load %arg2[%c2, %c0_14, %c0_15] : memref<3x16x48xf32, #tpu.memory_space<vmem>>, vector<1x16x48xf32>
    %42 = vector.shape_cast %41 : vector<1x16x48xf32> to vector<16x48xf32>
    %cst_16 = arith.constant dense<0.000000e+00> : vector<16x128xf32>
    %43 = tpu.matmul %42, %33, %cst_16 {dimension_numbers = #tpu.dot_dimension_numbers<[1], [0], [0], [1], [0, 0, 1, 1], [], []>} : vector<16x48xf32>, vector<48x128xf32>, vector<16x128xf32> -> vector<16x128xf32>
    %44 = arith.addf %40, %43 : vector<16x128xf32>
    %c0_17 = arith.constant 0 : index
    %c0_18 = arith.constant 0 : index
    %45 = vector.load %arg3[%c0_17, %c0_18] : memref<16x1xf32, #tpu.memory_space<vmem>>, vector<16x1xf32>
    %46 = vector.broadcast %45 : vector<16x1xf32> to vector<16x128xf32>
    %47 = arith.addf %44, %46 : vector<16x128xf32>
    %cst_19 = arith.constant 0.000000e+00 : f32
    %48 = vector.broadcast %cst_19 : f32 to vector<16x128xf32>
    %49 = arith.maximumf %47, %48 : vector<16x128xf32>
    %c1_i32_20 = arith.constant 1 : i32
    %50 = tpu.dynamic_rotate %49 by %c1_i32_20 dim 1 : vector<16x128xf32>, i32 -> vector<16x128xf32>
    %c0_i32_21 = arith.constant 0 : i32
    %51 = arith.sitofp %c0_i32_21 : i32 to f32
    %52 = vector.shape_cast %19 : vector<1x128xi1> to vector<1x128xi1>
    %53 = vector.broadcast %52 : vector<1x128xi1> to vector<16x128xi1>
    %54 = vector.broadcast %51 : f32 to vector<16x128xf32>
    %55 = arith.select %53, %50, %54 : vector<16x128xi1>, vector<16x128xf32>
    %c127_i32_22 = arith.constant 127 : i32
    %56 = tpu.dynamic_rotate %49 by %c127_i32_22 dim 1 : vector<16x128xf32>, i32 -> vector<16x128xf32>
    %c0_i32_23 = arith.constant 0 : i32
    %57 = arith.sitofp %c0_i32_23 : i32 to f32
    %58 = vector.shape_cast %21 : vector<1x128xi1> to vector<1x128xi1>
    %59 = vector.broadcast %58 : vector<1x128xi1> to vector<16x128xi1>
    %60 = vector.broadcast %57 : f32 to vector<16x128xf32>
    %61 = arith.select %59, %56, %60 : vector<16x128xi1>, vector<16x128xf32>
    %c0_24 = arith.constant 0 : index
    %c0_25 = arith.constant 0 : index
    %c0_26 = arith.constant 0 : index
    %62 = vector.load %arg4[%c0_24, %c0_25, %c0_26] : memref<3x8x16xf32, #tpu.memory_space<vmem>>, vector<1x8x16xf32>
    %63 = vector.shape_cast %62 : vector<1x8x16xf32> to vector<8x16xf32>
    %cst_27 = arith.constant dense<0.000000e+00> : vector<8x128xf32>
    %64 = tpu.matmul %63, %55, %cst_27 {dimension_numbers = #tpu.dot_dimension_numbers<[1], [0], [0], [1], [0, 0, 1, 1], [], []>} : vector<8x16xf32>, vector<16x128xf32>, vector<8x128xf32> -> vector<8x128xf32>
    %c1_28 = arith.constant 1 : index
    %c0_29 = arith.constant 0 : index
    %c0_30 = arith.constant 0 : index
    %65 = vector.load %arg4[%c1_28, %c0_29, %c0_30] : memref<3x8x16xf32, #tpu.memory_space<vmem>>, vector<1x8x16xf32>
    %66 = vector.shape_cast %65 : vector<1x8x16xf32> to vector<8x16xf32>
    %cst_31 = arith.constant dense<0.000000e+00> : vector<8x128xf32>
    %67 = tpu.matmul %66, %49, %cst_31 {dimension_numbers = #tpu.dot_dimension_numbers<[1], [0], [0], [1], [0, 0, 1, 1], [], []>} : vector<8x16xf32>, vector<16x128xf32>, vector<8x128xf32> -> vector<8x128xf32>
    %68 = arith.addf %64, %67 : vector<8x128xf32>
    %c2_32 = arith.constant 2 : index
    %c0_33 = arith.constant 0 : index
    %c0_34 = arith.constant 0 : index
    %69 = vector.load %arg4[%c2_32, %c0_33, %c0_34] : memref<3x8x16xf32, #tpu.memory_space<vmem>>, vector<1x8x16xf32>
    %70 = vector.shape_cast %69 : vector<1x8x16xf32> to vector<8x16xf32>
    %cst_35 = arith.constant dense<0.000000e+00> : vector<8x128xf32>
    %71 = tpu.matmul %70, %61, %cst_35 {dimension_numbers = #tpu.dot_dimension_numbers<[1], [0], [0], [1], [0, 0, 1, 1], [], []>} : vector<8x16xf32>, vector<16x128xf32>, vector<8x128xf32> -> vector<8x128xf32>
    %72 = arith.addf %68, %71 : vector<8x128xf32>
    %c0_36 = arith.constant 0 : index
    %c0_37 = arith.constant 0 : index
    %73 = vector.load %arg5[%c0_36, %c0_37] : memref<8x1xf32, #tpu.memory_space<vmem>>, vector<8x1xf32>
    %74 = vector.broadcast %73 : vector<8x1xf32> to vector<8x128xf32>
    %75 = arith.addf %72, %74 : vector<8x128xf32>
    %cst_38 = arith.constant 0.000000e+00 : f32
    %76 = vector.broadcast %cst_38 : f32 to vector<8x128xf32>
    %77 = arith.maximumf %75, %76 : vector<8x128xf32>
    %c0_39 = arith.constant 0 : index
    %c0_40 = arith.constant 0 : index
    %78 = vector.load %arg8[%c0_39, %c0_40] : memref<128x4xf32, #tpu.memory_space<vmem>>, vector<128x4xf32>
    %cst_41 = arith.constant dense<0.000000e+00> : vector<8x4xf32>
    %79 = tpu.matmul %77, %78, %cst_41 {dimension_numbers = #tpu.dot_dimension_numbers<[1], [0], [0], [1], [0, 0, 1, 1], [], []>} : vector<8x128xf32>, vector<128x4xf32>, vector<8x4xf32> -> vector<8x4xf32>
    %c0_42 = arith.constant 0 : index
    %c0_43 = arith.constant 0 : index
    %80 = vector.load %arg6[%c0_42, %c0_43] : memref<2x8xf32, #tpu.memory_space<vmem>>, vector<2x8xf32>
    %cst_44 = arith.constant dense<0.000000e+00> : vector<2x4xf32>
    %81 = tpu.matmul %80, %79, %cst_44 {dimension_numbers = #tpu.dot_dimension_numbers<[1], [0], [0], [1], [0, 0, 1, 1], [], []>} : vector<2x8xf32>, vector<8x4xf32>, vector<2x4xf32> -> vector<2x4xf32>
    %c0_45 = arith.constant 0 : index
    %c0_46 = arith.constant 0 : index
    %82 = vector.load %arg7[%c0_45, %c0_46] : memref<2x1xf32, #tpu.memory_space<vmem>>, vector<2x1xf32>
    %83 = vector.broadcast %82 : vector<2x1xf32> to vector<2x4xf32>
    %84 = arith.addf %81, %83 : vector<2x4xf32>
    %c0_47 = arith.constant 0 : index
    %c0_48 = arith.constant 0 : index
    %c0_49 = arith.constant 0 : index
    %85 = vector.load %arg9[%c0_47, %c0_48, %c0_49] : memref<1x2x4xf32, #tpu.memory_space<vmem>>, vector<1x2x4xf32>
    %86 = vector.shape_cast %85 : vector<1x2x4xf32> to vector<2x4xf32>
    %87 = vector.shape_cast %84 : vector<2x4xf32> to vector<1x2x4xf32>
    tpu.vector_store %arg9[%c0_47, %c0_48, %c0_49], %87 {strides = array<i32>} : memref<1x2x4xf32, #tpu.memory_space<vmem>>, vector<1x2x4xf32>,
    return
  }
  func.func @transform_0(%arg0: i32) -> (i32, i32) {
    %c0_i32 = arith.constant 0 : i32
    %c0_i32_0 = arith.constant 0 : i32
    return %c0_i32, %arg0 : i32, i32
  }
  func.func @transform_1(%arg0: i32) -> (i32, i32, i32) {
    %c0_i32 = arith.constant 0 : i32
    %c0_i32_0 = arith.constant 0 : i32
    %c0_i32_1 = arith.constant 0 : i32
    %c0_i32_2 = arith.constant 0 : i32
    return %c0_i32, %c0_i32_0, %c0_i32_1 : i32, i32, i32
  }
  func.func @transform_2(%arg0: i32) -> (i32, i32) {
    %c0_i32 = arith.constant 0 : i32
    %c0_i32_0 = arith.constant 0 : i32
    %c0_i32_1 = arith.constant 0 : i32
    return %c0_i32, %c0_i32_0 : i32, i32
  }
  func.func @transform_3(%arg0: i32) -> (i32, i32, i32) {
    %c0_i32 = arith.constant 0 : i32
    %c0_i32_0 = arith.constant 0 : i32
    %c0_i32_1 = arith.constant 0 : i32
    %c0_i32_2 = arith.constant 0 : i32
    return %c0_i32, %c0_i32_0, %c0_i32_1 : i32, i32, i32
  }
  func.func @transform_4(%arg0: i32) -> (i32, i32) {
    %c0_i32 = arith.constant 0 : i32
    %c0_i32_0 = arith.constant 0 : i32
    %c0_i32_1 = arith.constant 0 : i32
    return %c0_i32, %c0_i32_0 : i32, i32
  }
  func.func @transform_5(%arg0: i32) -> (i32, i32) {
    %c0_i32 = arith.constant 0 : i32
    %c0_i32_0 = arith.constant 0 : i32
    %c0_i32_1 = arith.constant 0 : i32
    return %c0_i32, %c0_i32_0 : i32, i32
  }
  func.func @transform_6(%arg0: i32) -> (i32, i32) {
    %c0_i32 = arith.constant 0 : i32
    %c0_i32_0 = arith.constant 0 : i32
    %c0_i32_1 = arith.constant 0 : i32
    return %c0_i32, %c0_i32_0 : i32, i32
  }
  func.func @transform_7(%arg0: i32) -> (i32, i32) {
    %c0_i32 = arith.constant 0 : i32
    %c0_i32_0 = arith.constant 0 : i32
    %c0_i32_1 = arith.constant 0 : i32
    return %c0_i32, %c0_i32_0 : i32, i32
  }
  func.func @transform_8(%arg0: i32) -> (i32, i32, i32) {
    %c0_i32 = arith.constant 0 : i32
    %c0_i32_0 = arith.constant 0 : i32
    %c0_i32_1 = arith.constant 0 : i32
    return %arg0, %c0_i32, %c0_i32_0 : i32, i32, i32
  }
}

</mosaic_0001>

<bundles_post_ra>
// kernel: tpu_custom_call.1
= control target key start
LH: loop header
LB: loop body
LE: loop exit
PB: predicated region body
PF: predicated region fallthrough
CT: control target
= control target key end

     0   :  { %vm97_vm0 = vcmask 392192   ;;  %s1382_s0 = inlined_call_operand.vmem [shape: f32[48,128], index: 0, kind: input, shape index: {}]   ;;  %s1383_s1 = inlined_call_operand.vmem [shape: f32[3,16,48], index: 1, kind: input, shape index: {}]   ;;  %s1384_s2 = inlined_call_operand.vmem [shape: f32[16,1], index: 2, kind: input, shape index: {}]   ;;  %s1385_s3 = inlined_call_operand.vmem [shape: f32[3,8,16], index: 3, kind: input, shape index: {}]   ;;  %s1386_s4 = inlined_call_operand.vmem [shape: f32[8,1], index: 4, kind: input, shape index: {}]   ;;  %s1387_s5 = inlined_call_operand.vmem [shape: f32[2,8], index: 5, kind: input, shape index: {}]   ;;  %s1388_s6 = inlined_call_operand.vmem [shape: f32[2,1], index: 6, kind: input, shape index: {}]   ;;  %s1389_s7 = inlined_call_operand.vmem [shape: f32[128,4], index: 7, kind: input, shape index: {}]   ;;  %s1390_s8 = inlined_call_operand.hbm [shape: f32[1,2,4], index: 8, kind: output, shape index: {}]  }
   0x1   :  { %v30_v0 = vld [vmem:[%s1382_s0] sm:$0xff]  ;;  %v31_v1 = vld [vmem:[%s1382_s0 + $0x8] sm:$0xff]  ;;  %v32_v2 = vld [vmem:[%s1382_s0 + $0x10] sm:$0xff] }
   0x2   :  { %v1075_v3 = vpack.i.bf16 %v31_v1, %v30_v0  ;;  %v33_v4 = vld [vmem:[%s1382_s0 + $0x18] sm:$0xff]  ;;  %v34_v5 = vld [vmem:[%s1382_s0 + $0x20] sm:$0xff]  ;;  %v35_v6 = vld [vmem:[%s1382_s0 + $0x28] sm:$0xff]  ;;  %v981_v7 = vpack.c.bf16 %v31_v1, %v30_v0 }
   0x3   :  { %v1085_v8 = vpack.i.bf16 %v35_v6, %v34_v5  ;;  %v791_v9 = vld [vmem:[%s1383_s1 + $0x10] sm:$0xff] }
   0x4   :  { %13 = vsyncpa [#allocation3], 0  ;;  %s1141_s19 = smov 1   ;;  %v1080_v10 = vpack.i.bf16 %v33_v4, %v32_v2  ;;  %982 = vmatprep.subr.bf16.mxu0 %v981_v7  ;;  %v985_v11 = vpack.c.bf16 %v33_v4, %v32_v2  ;;  %v989_v12 = vpack.c.bf16 %v35_v6, %v34_v5  ;;  %887 = vmatprep.mubr.msk.f32.mxu0 %vm97_vm0, %v791_v9  ;;  %s1142_s0 = smov 127   ;;  %v792_v13 = vld [vmem:[%s1383_s1 + $0x18] sm:$0xff]  ;;  %v92_v14 = vld [vmem:[%s1383_s1] sm:$0xff]  ;;  %v36_v18 = vlaneseq }
   0x5   :  { %1076 = vrot.lane.b32.xlu0 %v1075_v3, %s1141_s19  ;;  %1086 = vrot.lane.b32.xlu1 %v1085_v8, %s1141_s19  ;;  %v347_v15 = vld [vmem:[%s1384_s2 + $0x8] sm:$0xff]  ;;  %v346_v16 = vld [vmem:[%s1384_s2] sm:$0xff]  ;;  %v1143_v17 = vmov 0   ;;  %v1144_v50 = vmov 0.0|0.0   ;;  %vm1145_vm5 = vmmov 0   ;;  %v1146_v51 = vmov 0.0  }
   0x6   :  { %984 = vmatpush3.bf16.msra.mxu0 %v981_v7  ;;  %1106 = vset.pattern.permute.xlu1 %v1143_v17  ;;  %v37_v19 = vand.u32 127, %v36_v18  ;;  %v93_v43 = vld [vmem:[%s1383_s1 + $0x8] sm:$0xff]  ;;  %v803_v47 = vld [vmem:[%s1383_s1 + $0x20] sm:$0xff]  ;;  %vm377_vm6 = vcmask 130048   ;;  %vm701_vm7 = vcmask 64512   ;;  %vm775_vm8 = vcmask 25600  }
   0x7   :  { %986 = vmatprep.subr.bf16.mxu0 %v985_v11  ;;  %1105 = vset.pattern.permute.xlu0 %v1143_v17  ;;  %v804_v49 = vld [vmem:[%s1383_s1 + $0x28] sm:$0xff]  ;;  %v695_v62 = vld [vmem:[%s1388_s6] sm:$0x3] }
   0x8   :  { %v42_v20 = vand.u32 31, %v37_v19  ;;  %1029 = vmatprep.subr.bf16.mxu1 %v1144_v50  ;;  %924 = vmatprep.mubr.msk.f32.mxu1 %vm1145_vm5, %v1146_v51  ;;  %v600_v63 = vld [vmem:[%s1386_s4] sm:$0xff]  ;;  %v813_v0 = vld [vmem:[%s1385_s3 + $0x8] sm:$0xff] }
   0x9   :  { %1081 = vrot.lane.b32.xlu0 %v1080_v10, %s1141_s19  ;;  %1091 = vrot.lane.b32.xlu1 %v1075_v3, %s1142_s0  ;;  %v608_v9 = vld [vmem:[%s1389_s7] sm:$0xff]  ;;  %v613_v18 = vld [vmem:[%s1389_s7 + $0x28] sm:$0xff] }
   0xa   :  { %988 = vmatpush3.bf16.msra.mxu0 %v985_v11  ;;  %vm50_vm1 = vcmp.ne.s32.totalorder %v42_v20, 0  ;;  %vm51_vm3 = vcmp.ne.s32.totalorder %v42_v20, 31  ;;  %v612_v17 = vld [vmem:[%s1389_s7 + $0x20] sm:$0xff]  ;;  %v614_v20 = vld [vmem:[%s1389_s7 + $0x30] sm:$0xff] }
   0xb   :  { %990 = vmatprep.subr.bf16.mxu0 %v989_v12  ;;  %vm1235_vm2 = vmpackc.low %vm50_vm1, %vm50_vm1  ;;  %v1047_v19 = vpack.c.bf16 %v613_v18, %v612_v17 }
   0xc   :  { %vm1249_vm4 = vmpackc.low %vm51_vm3, %vm51_vm3 }
   0xd   :  { %1096 = vrot.lane.b32.xlu0 %v1080_v10, %s1142_s0  ;;  %1101 = vrot.lane.b32.xlu1 %v1085_v8, %s1142_s0  ;;  %v374_v8 = vld [vmem:[%s1385_s3] sm:$0xff]  ;;  %v609_v10 = vld [vmem:[%s1389_s7 + $0x8] sm:$0xff] }
   0xe   :  { %992 = vmatpush3.bf16.msra.mxu0 %v989_v12  ;;  %v818_v12 = vld [vmem:[%s1385_s3 + $0x10] sm:$0xff] }
  0x11   :  { %888 = vmatmul.mubr.msk.f32.vlgmr.msra.gmra.mrb[0].mxu0 %vm97_vm0, %v792_v13  ;;  %355 = vperm.xlu1 %1106, %v347_v15   ;;  %v1041_v13 = vpack.c.bf16 %v609_v10, %v608_v9  ;;  %v611_v15 = vld [vmem:[%s1389_s7 + $0x18] sm:$0xff] }
  0x12   :  { %902 = vmatprep.mubr.msk.f32.mxu0 %vm97_vm0, %v92_v14  ;;  %350 = vperm.xlu0 %1105, %v346_v16   ;;  %v610_v14 = vld [vmem:[%s1389_s7 + $0x10] sm:$0xff] }
  0x13   :  { %v1044_v16 = vpack.c.bf16 %v611_v15, %v610_v14 }
  0x77   :  { %v1077_v21 = vpop.permute.xlu0 %1076  ;;  %v1087_v24 = vpop.permute.xlu1 %1086 }
  0x78   :  { %v1079_v22 = vunpack.i.h.bf16 %v1077_v21  ;;  %v1078_v23 = vunpack.i.l.bf16 %v1077_v21  ;;  %v1089_v27 = vunpack.i.h.bf16 %v1087_v24  ;;  %v1088_v28 = vunpack.i.l.bf16 %v1087_v24  ;;  %v615_v21 = vld [vmem:[%s1389_s7 + $0x38] sm:$0xff]  ;;  %v617_v24 = vld [vmem:[%s1389_s7 + $0x48] sm:$0xff] }
  0x7a   :  { %v993_v26 = vpack.c.bf16 %v1079_v22, %v1078_v23  ;;  %v1005_v34 = vpack.c.bf16 %v1089_v27, %v1088_v28  ;;  %v1050_v22 = vpack.c.bf16 %v615_v21, %v614_v20  ;;  %v616_v23 = vld [vmem:[%s1389_s7 + $0x40] sm:$0xff]  ;;  %v619_v27 = vld [vmem:[%s1389_s7 + $0x58] sm:$0xff] }
  0x7b   :  { %v1082_v29 = vpop.permute.xlu0 %1081  ;;  %v1092_v32 = vpop.permute.xlu1 %1091  ;;  %v1053_v25 = vpack.c.bf16 %v617_v24, %v616_v23 }
  0x7c   :  { %v1084_v30 = vunpack.i.h.bf16 %v1082_v29  ;;  %v1083_v31 = vunpack.i.l.bf16 %v1082_v29  ;;  %995 = vmatprep.subr.msk.bf16.mxu0 %vm1235_vm2, %v993_v26  ;;  %v1094_v35 = vunpack.i.h.bf16 %v1092_v32  ;;  %v1093_v36 = vunpack.i.l.bf16 %v1092_v32  ;;  %v620_v29 = vld [vmem:[%s1389_s7 + $0x60] sm:$0xff]  ;;  %v622_v32 = vld [vmem:[%s1389_s7 + $0x70] sm:$0xff] }
  0x7d   :  { %998 = vmatpush3.bf16.msk.msra.mxu0 %vm1235_vm2, %v993_v26  ;;  %v618_v26 = vld [vmem:[%s1389_s7 + $0x50] sm:$0xff] }
  0x7e   :  { %v999_v33 = vpack.c.bf16 %v1084_v30, %v1083_v31  ;;  %v1011_v38 = vpack.c.bf16 %v1094_v35, %v1093_v36  ;;  %v1056_v28 = vpack.c.bf16 %v619_v27, %v618_v26  ;;  %v621_v30 = vld [vmem:[%s1389_s7 + $0x68] sm:$0xff] }
  0x7f   :  { %v1097_v37 = vpop.permute.xlu0 %1096  ;;  %v1102_v42 = vpop.permute.xlu1 %1101  ;;  %v1059_v31 = vpack.c.bf16 %v621_v30, %v620_v29 }
  0x80   :  { %1001 = vmatprep.subr.msk.bf16.mxu0 %vm1235_vm2, %v999_v33  ;;  %v1099_v39 = vunpack.i.h.bf16 %v1097_v37  ;;  %v1098_v40 = vunpack.i.l.bf16 %v1097_v37  ;;  %v1104_v45 = vunpack.i.h.bf16 %v1102_v42  ;;  %v1103_v46 = vunpack.i.l.bf16 %v1102_v42 }
  0x81   :  { %1004 = vmatpush3.bf16.msk.msra.mxu0 %vm1235_vm2, %v999_v33  ;;  %v623_v33 = vld [vmem:[%s1389_s7 + $0x78] sm:$0xff]  ;;  %s1147_s7 = smov [#allocation2]  }
  0x82   :  { %1007 = vmatprep.subr.msk.bf16.mxu0 %vm1235_vm2, %v1005_v34  ;;  %v1017_v44 = vpack.c.bf16 %v1099_v39, %v1098_v40  ;;  %v1023_v48 = vpack.c.bf16 %v1104_v45, %v1103_v46  ;;  %v694_v46 = vld [vmem:[%s1387_s5] sm:$0x3]  ;;  %s783_s23 = sshll.u32 %s1147_s7, 4  ;;  %s784_s23 = int_to_ptr.vmem [resolvable:$true] %s783_s23 }
  0x83   :  { %s1117_s24 = scalar_lea.vmem %s784_s23, 32  ;;  %p1122_p1 = scmp.lt.s32.totalorder %s784_s23, %s784_s23 }
  0x84   :  { %p1118_p0 = scmp.ne.s32.totalorder %s784_s23, %s1117_s24  ;;  %p1123_p2 = scmp.lt.s32.totalorder %s1117_s24, %s1117_s24 }
  0x85   :  { %1010 = vmatpush3.bf16.msk.msra.mxu0 %vm1235_vm2, %v1005_v34  ;;  %v1062_v34 = vpack.c.bf16 %v623_v33, %v622_v32 }
  0x86   :  { %1013 = vmatprep.subr.msk.bf16.mxu0 %vm1249_vm4, %v1011_v38  ;;  %p1124_p3 = por %p1123_p2, %p1122_p1 }
  0x88   :  { %903 = vmatmul.mubr.msk.f32.vlgmr.msra.gmra.mrb[0].mxu0 %vm97_vm0, %v93_v43  ;;  %p1125_p4 = pnand %p1124_p3, %p1118_p0 }
  0x89   :  { %1016 = vmatpush3.bf16.msk.msra.mxu0 %vm1249_vm4, %v1011_v38  ;;  %917 = vmatprep.mubr.msk.f32.mxu0 %vm97_vm0, %v803_v47 }
  0x8a   :  { %1019 = vmatprep.subr.msk.bf16.mxu0 %vm1249_vm4, %v1017_v44 }
  0x8d   :  { %1022 = vmatpush3.bf16.msk.msra.mxu0 %vm1249_vm4, %v1017_v44 }
  0x8e   :  { %1025 = vmatprep.subr.msk.bf16.mxu0 %vm1249_vm4, %v1023_v48 }
  0x90   :  { %v356_v52 = vpop.permute.xlu1 %355 }
  0x91   :  { %1028 = vmatpush3.bf16.msk.msra.mxu0 %vm1249_vm4, %v1023_v48  ;;  %v351_v53 = vpop.permute.xlu0 %350 }
  0x92   :  { %976 = vmatprep.subr.mxu0 %v1146_v51 }
  0x94   :  { %918 = vmatmul.mubr.msk.f32.vlgmr.msra.gmra.mrb[0].mxu0 %vm97_vm0, %v804_v49 }
  0x95   :  { %978 = vmatprep.mubr.msk.f32.mxu0 %vm1145_vm5, %v1146_v51 }
 0x167   :  { %v919_v54 = vpop.f32.mrb[0].mxu0 }
 0x168   :  { %v359_v55 = vadd.f32 %v919_v54, %v356_v52  ;;  %v335_v56 = vpop.f32.mrb[1].mxu0 }
 0x169   :  { %v358_v57 = vadd.f32 %v351_v53, %v335_v56 }
 0x16a   :  { %v361_v58 = vmax.f32 %v359_v55, 0.0 }
 0x16b   :  { %v360_v59 = vmax.f32 %v358_v57, 0.0 }
 0x16d   :  { %v1112_v60 = vpack.i.bf16 %v361_v58, %v360_v59  ;;  %v1030_v61 = vpack.c.bf16 %v361_v58, %v360_v59 }
 0x16f   :  { %1113 = vrot.lane.b32.xlu0 %v1112_v60, %s1142_s0  ;;  %1108 = vrot.lane.b32.xlu1 %v1112_v60, %s1141_s19 }
 0x170   :  { %1031 = vmatpush3.bf16.msra.mxu1 %v1030_v61 }
 0x171   :  { %1032 = vmatprep.subr.bf16.mxu1 %v1144_v50 }
 0x173   :  { %698 = vperm.xlu0 %1105, %v695_v62   ;;  %603 = vperm.xlu1 %1106, %v600_v63  }
 0x174   :  { %925 = vmatmul.mubr.msk.f32.vlgmr.msra.gmra.mrb[0].mxu1 %vm377_vm6, %v813_v0 }
 0x175   :  { %931 = vmatprep.mubr.msk.f32.mxu1 %vm1145_vm5, %v1146_v51 }
 0x1e1   :  { %v1114_v1 = vpop.permute.xlu0 %1113  ;;  %v1109_v2 = vpop.permute.xlu1 %1108 }
 0x1e2   :  { %v1111_v3 = vunpack.i.h.bf16 %v1109_v2  ;;  %v1110_v4 = vunpack.i.l.bf16 %v1109_v2  ;;  %v1116_v5 = vunpack.i.h.bf16 %v1114_v1  ;;  %v1115_v6 = vunpack.i.l.bf16 %v1114_v1 }
 0x1e4   :  { %v1033_v7 = vpack.c.bf16 %v1111_v3, %v1110_v4  ;;  %v1037_v11 = vpack.c.bf16 %v1116_v5, %v1115_v6 }
 0x1e6   :  { %1035 = vmatpush3.bf16.msk.msra.mxu1 %vm1235_vm2, %v1033_v7 }
 0x1e7   :  { %1036 = vmatprep.subr.bf16.mxu1 %v1144_v50 }
 0x1e9   :  { %932 = vmatmul.mubr.msk.f32.vlgmr.msra.gmra.mrb[2].mxu1 %vm377_vm6, %v374_v8 }
 0x1ea   :  { %1039 = vmatpush3.bf16.msk.msra.mxu1 %vm1249_vm4, %v1037_v11  ;;  %938 = vmatprep.mubr.msk.f32.mxu1 %vm1145_vm5, %v1146_v51 }
 0x1eb   :  { %1040 = vmatprep.subr.bf16.mxu1 %v1144_v50 }
 0x1ed   :  { %939 = vmatmul.mubr.msk.f32.vlgmr.msra.gmra.mrb[4].mxu1 %vm377_vm6, %v818_v12 }
 0x1ee   :  { %1042 = vmatpush3.bf16.msra.mxu1 %v1041_v13  ;;  %973 = vmatprep.mubr.msk.f32.mxu1 %vm1145_vm5, %v1146_v51 }
 0x1ef   :  { %1043 = vmatprep.subr.bf16.mxu1 %v1144_v50 }
 0x1f2   :  { %1045 = vmatpush3.bf16.msra.mxu1 %v1044_v16  ;;  %v604_v43 = vpop.permute.xlu1 %603  ;;  %v699_v49 = vpop.permute.xlu0 %698 }
 0x1f3   :  { %1046 = vmatprep.subr.bf16.mxu1 %v1144_v50 }
 0x1f6   :  { %1048 = vmatpush3.bf16.msra.mxu1 %v1047_v19 }
 0x1f7   :  { %1049 = vmatprep.subr.bf16.mxu1 %v1144_v50 }
 0x1fa   :  { %1051 = vmatpush3.bf16.msra.mxu1 %v1050_v22 }
 0x1fb   :  { %1052 = vmatprep.subr.bf16.mxu1 %v1144_v50 }
 0x1fe   :  { %1054 = vmatpush3.bf16.msra.mxu1 %v1053_v25 }
 0x1ff   :  { %1055 = vmatprep.subr.bf16.mxu1 %v1144_v50 }
 0x202   :  { %1057 = vmatpush3.bf16.msra.mxu1 %v1056_v28 }
 0x203   :  { %1058 = vmatprep.subr.bf16.mxu1 %v1144_v50 }
 0x206   :  { %1060 = vmatpush3.bf16.msra.mxu1 %v1059_v31 }
 0x207   :  { %1061 = vmatprep.subr.bf16.mxu1 %v1144_v50 }
 0x20a   :  { %1063 = vmatpush3.bf16.msra.mxu1 %v1062_v34 }
 0x247   :  { %v447_v35 = vpop.f32.mrb[0].mxu1 }
 0x248   :  { %v926_v36 = vpop.f32.mrb[1].mxu1 }
 0x2bc   :  { %v520_v37 = vpop.f32.mrb[2].mxu1 }
 0x2bd   :  { %v521_v38 = vadd.f32 %v520_v37, %v447_v35  ;;  %v933_v39 = vpop.f32.mrb[3].mxu1 }
 0x2c0   :  { %v595_v40 = vpop.f32.mrb[4].mxu1 }
 0x2c1   :  { %v599_v41 = vadd.f32 %v595_v40, %v521_v38  ;;  %v940_v42 = vpop.f32.mrb[5].mxu1 }
 0x2c3   :  { %v606_v44 = vadd.f32 %v604_v43, %v599_v41 }
 0x2c5   :  { %v607_v45 = vmax.f32 %v606_v44, 0.0 }
 0x2c7   :  { %974 = vmatmul.mubr.f32.vlgmr.msra.gmra.mrb[6].mxu1 %v607_v45 }
 0x39a   :  { %v690_v47 = vpop.f32.mrb[6].mxu1 }
 0x39b   :  { %v975_v48 = vpop.f32.mrb[7].mxu1  ;;  %977 = vmatpush3.msra.mxu0 %v690_v47 }
 0x39c   :  { %979 = vmatmul.mubr.msk.f32.vlgmr.msra.gmra.mrb[2].mxu0 %vm701_vm7, %v694_v46 }
 0x46f   :  { %v771_v50 = vpop.f32.mrb[2].mxu0 }
 0x470   :  { %v772_v51 = vadd.f32 %v771_v50, %v699_v49  ;;  %v980_v52 = vpop.f32.mrb[3].mxu0 }
 0x472   :  { %776 = vst.msk [vmem:[#allocation2] sm:$0x3] %vm775_vm8, %v772_v51 }
 0x473   :  { %1128 = shalt.err (!%p1125_p4)
}
 0x474   :  { %s1129_s25 = scalar_lea.hbm %s1390_s8, 32 }
 0x475   :  { %p1130_p5 = scmp.ne.s32.totalorder %s1390_s8, %s1129_s25  ;;  %p1133_p6 = scmp.lt.u32.totalorder %s1129_s25, %s1390_s8 }
 0x477   :  { %p1135_p7 = pnand %p1133_p6, %p1130_p5 }
 0x479   :  { %1138 = shalt.err (!%p1135_p7)
}
 0x47a   :  { %786 = dma.vmem_to_hbm [thread:$0]  %s784_s23, 32, %s1390_s8, [#allocation3]  }
 0x47b   :  { %1139 = dma.done.wait [#allocation3], 32  }
 0x47c   :  { %1140 = vsyncadd [#allocation3], 4294967264 }
 0x47d   :  { %790 = vsyncpa [#allocation3], 1 }

</bundles_post_ra>
